<compile_context>
chip_gen: v6e
topology: v6e:2x2x1
jax: 0.10.0
libtpu: 0.0.40
codegen_flags: <defaults>
</compile_context>

<pallas_src>
import functools
import math

import jax
import jax.numpy as jnp
import numpy as np
from jax import lax
from jax.experimental import pallas as pl
from jax.experimental.pallas import tpu as pltpu

EMBED = 32          # embed_size
HEADS = 4           # heads
HEAD_DIM = EMBED // HEADS
assert HEAD_DIM * HEADS == EMBED


def _self_attention_kernel(x_ref, bias_ref, wqkv_ref, bqkv_ref, wo_ref, bo_ref,
                           out_ref, *, lv, lk, lq, heads, head_dim):
    embed = heads * head_dim
    bt, lcat, _ = x_ref.shape           # lcat = lv + lk + lq

    wqkv = wqkv_ref[...]                # (E, 3E); query block pre-scaled by 1/sqrt(E)
    bqkv = bqkv_ref[...]                # (1, 3E)
    wo = wo_ref[...]                    # (E, E)
    bo = bo_ref[...]                    # (1, E)

    # Single fused QKV projection for every row of every batch in the tile.
    x = x_ref[...].reshape(bt * lcat, embed)
    proj = jnp.dot(x, wqkv, preferred_element_type=jnp.float32) + bqkv
    proj = proj.reshape(bt, lcat, 3 * embed)

    for b in range(bt):                 # static loop over batches in the tile
        vp = proj[b, 0:lv, 0:embed]                    # (Lv, E) value projection
        kp = proj[b, lv:lv + lk, embed:2 * embed]      # (Lk, E) key projection
        qp = proj[b, lv + lk:lcat, 2 * embed:]         # (Lq, E) scaled query projection
        bias = bias_ref[b]                             # (Lq, Lk) additive mask bias

        out_acc = jnp.zeros((lq, embed), jnp.float32)
        for h in range(heads):          # static loop over heads
            sl = slice(h * head_dim, (h + 1) * head_dim)
            qh = qp[:, sl]              # (Lq, D)
            kh = kp[:, sl]              # (Lk, D)
            vh = vp[:, sl]              # (Lv, D)

            # energy[q, k] = qh . kh  (contract head dim; no explicit transpose)
            energy = lax.dot_general(
                qh, kh, dimension_numbers=(((1,), (1,)), ((), ())),
                preferred_element_type=jnp.float32)
            # masked positions get ~-1e20 (equivalent post-softmax to torch's
            # masked_fill-before-scale).
            energy = energy + bias

            m = jnp.max(energy, axis=-1, keepdims=True)
            p = jnp.exp(energy - m)
            denom = jnp.sum(p, axis=-1, keepdims=True)
            attn = p * pl.reciprocal(denom, approx=True)     # EUP reciprocal

            head_out = jnp.dot(attn, vh, preferred_element_type=jnp.float32)
            # Accumulate the output projection per head (no lane-axis concat).
            out_acc = out_acc + jnp.dot(head_out, wo[sl, :],
                                        preferred_element_type=jnp.float32)

        out_ref[b] = out_acc + bo


def self_attention(values, keys, query, mask, params, *, batch_tile=1):
    """SelfAttention.forward.

    values/keys/query: (N, Lv/Lk/Lq, E) f32.
    mask: broadcastable to (N, 1, Lq, Lk) (0 = masked), or None.
    params: torch-layout (wv, bv, wk, bk, wq, bq, wo, bo), weights (out, in).
    batch_tile: batches processed per grid step (set to N on single-TC chips
    such as v5e/v6e to collapse the grid; default 1 keeps a parallel grid
    for v7x's two TensorCores).
    """
    N, Lq, E = query.shape
    Lk = keys.shape[1]
    Lv = values.shape[1]
    Lcat = Lv + Lk + Lq
    assert E == EMBED
    assert N % batch_tile == 0

    wv, bv, wk, bk, wq, bq, wo, bo = params
    scale = 1.0 / math.sqrt(E)

    # Fuse the three projection weights; fold the softmax scale into the
    # query block (constant-folded at wrapper build time).
    wqkv = jnp.concatenate([wv.T, wk.T, wq.T * scale], axis=1)    # (E, 3E)
    bqkv = jnp.concatenate([bv, bk, bq * scale])[None, :]         # (1, 3E)
    wo_t = wo.T                                                   # (E, E)
    bo_r = bo[None, :]                                            # (1, E)

    # Stack the three activation streams along the sequence axis so the
    # kernel can project them with one matmul.
    x_cat = jnp.concatenate([values, keys, query], axis=1)        # (N, Lcat, E)

    # Additive f32 mask bias, computed once outside the kernel
    # (assumes the usual (N, 1, Lq, Lk) head-broadcast mask).
    if mask is None:
        bias = jnp.zeros((N, Lq, Lk), jnp.float32)
    else:
        bias = jnp.where(mask == 0, jnp.float32(-1e20), jnp.float32(0.0))
        bias = jnp.broadcast_to(bias, (N, 1, Lq, Lk)).reshape(N, Lq, Lk)

    kernel = functools.partial(_self_attention_kernel,
                               lv=Lv, lk=Lk, lq=Lq,
                               heads=HEADS, head_dim=HEAD_DIM)

    bt = batch_tile
    grid = (N // bt,)

    return pl.pallas_call(
        kernel,
        out_shape=jax.ShapeDtypeStruct((N, Lq, E), jnp.float32),
        grid_spec=pl.GridSpec(
            grid=grid,
            in_specs=[
                pl.BlockSpec((bt, Lcat, E), lambda n: (n, 0, 0)),   # stacked acts
                pl.BlockSpec((bt, Lq, Lk), lambda n: (n, 0, 0)),    # mask bias
                pl.BlockSpec((E, 3 * E), lambda n: (0, 0)),         # fused W_qkv
                pl.BlockSpec((1, 3 * E), lambda n: (0, 0)),         # fused b_qkv
                pl.BlockSpec((E, E), lambda n: (0, 0)),             # W_out
                pl.BlockSpec((1, E), lambda n: (0, 0)),             # b_out
            ],
            out_specs=pl.BlockSpec((bt, Lq, E), lambda n: (n, 0, 0)),
        ),
        compiler_params=pltpu.CompilerParams(
            dimension_semantics=("parallel",)),
    )(x_cat, bias, wqkv, bqkv, wo_t, bo_r)


def _reference(values, keys, query, mask, wv, bv, wk, bk, wq, bq, wo, bo):
    """Pure-JAX replica of the PyTorch forward (weights in torch (out,in) layout)."""
    N, Lq, E = query.shape
    vp = (values @ wv.T + bv).reshape(N, -1, HEADS, HEAD_DIM)
    kp = (keys @ wk.T + bk).reshape(N, -1, HEADS, HEAD_DIM)
    qp = (query @ wq.T + bq).reshape(N, Lq, HEADS, HEAD_DIM)
    energy = jnp.einsum('nqhd,nkhd->nhqk', qp, kp)
    energy = jnp.where(mask == 0, jnp.float32(-1e20), energy)
    attn = jax.nn.softmax(energy / np.sqrt(E), axis=3)
    out = jnp.einsum('nhql,nlhd->nqhd', attn, vp).reshape(N, Lq, E)
    return out @ wo.T + bo


if __name__ == "__main__":
    N, L = 2, 8   # batch, seq
    key = jax.random.PRNGKey(0)
    ks = jax.random.split(key, 11)

    def linear_init(kw, kb, fan_in, fan_out):
        # PyTorch nn.Linear default init: U(-1/sqrt(fan_in), 1/sqrt(fan_in))
        bound = 1.0 / np.sqrt(fan_in)
        w = jax.random.uniform(kw, (fan_out, fan_in), jnp.float32, -bound, bound)
        b = jax.random.uniform(kb, (fan_out,), jnp.float32, -bound, bound)
        return w, b

    wv, bv = linear_init(ks[0], ks[1], EMBED, EMBED)
    wk, bk = linear_init(ks[2], ks[3], EMBED, EMBED)
    wq, bq = linear_init(ks[4], ks[5], EMBED, EMBED)
    wo, bo = linear_init(ks[6], ks[7], EMBED, EMBED)

    values = jax.random.normal(ks[8], (N, L, EMBED), jnp.float32)
    keys_in = jax.random.normal(ks[9], (N, L, EMBED), jnp.float32)
    query = jax.random.normal(ks[10], (N, L, EMBED), jnp.float32)

    # causal mask, broadcast over heads: (N, 1, Lq, Lk)
    causal = (jnp.arange(L)[None, :] <= jnp.arange(L)[:, None]).astype(jnp.int32)
    mask = jnp.broadcast_to(causal[None, None], (N, 1, L, L))

    params = (wv, bv, wk, bk, wq, bq, wo, bo)

    out = self_attention(values, keys_in, query, mask, params, batch_tile=1)
    out = jax.block_until_ready(out)

    ref = _reference(values, keys_in, query, mask, *params)
    # 2e-3 tolerance covers the approximate EUP reciprocal used for the
    # softmax normalization; genuine bugs produce O(0.1) errors.
    np.testing.assert_allclose(np.asarray(out), np.asarray(ref), rtol=2e-3, atol=2e-3)

    print("KERNEL_OK")
</pallas_src>

<mosaic_0001>
module attributes {stable_mosaic.version = 11 : i64} {
  func.func @_self_attention_kernel(%arg0: i32, %arg1: memref<1x24x32xf32, #tpu.memory_space<vmem>>, %arg2: memref<1x8x8xf32, #tpu.memory_space<vmem>>, %arg3: memref<32x96xf32, #tpu.memory_space<vmem>>, %arg4: memref<1x96xf32, #tpu.memory_space<vmem>>, %arg5: memref<32x32xf32, #tpu.memory_space<vmem>>, %arg6: memref<1x32xf32, #tpu.memory_space<vmem>>, %arg7: memref<1x8x32xf32, #tpu.memory_space<vmem>>) attributes {dimension_semantics = [#tpu.dimension_semantics<parallel>], iteration_bounds = array<i64: 2>, scalar_prefetch = 0 : i64, scratch_operands = 0 : i64, tpu.core_type = #tpu.core_type<tc>, window_params = [{transform_indices = @transform_0, window_bounds = array<i64: 1, 24, 32>}, {transform_indices = @transform_1, window_bounds = array<i64: 1, 8, 8>}, {pipeline_mode = #tpu.pipeline_mode<synchronous>, transform_indices = @transform_2, window_bounds = array<i64: 32, 96>}, {pipeline_mode = #tpu.pipeline_mode<synchronous>, transform_indices = @transform_3, window_bounds = array<i64: 1, 96>}, {pipeline_mode = #tpu.pipeline_mode<synchronous>, transform_indices = @transform_4, window_bounds = array<i64: 32, 32>}, {pipeline_mode = #tpu.pipeline_mode<synchronous>, transform_indices = @transform_5, window_bounds = array<i64: 1, 32>}, {transform_indices = @transform_6, window_bounds = array<i64: 1, 8, 32>}]} {
    %c0 = arith.constant 0 : index
    %c0_0 = arith.constant 0 : index
    %0 = vector.load %arg3[%c0, %c0_0] : memref<32x96xf32, #tpu.memory_space<vmem>>, vector<32x96xf32>
    %c0_1 = arith.constant 0 : index
    %c0_2 = arith.constant 0 : index
    %1 = vector.load %arg4[%c0_1, %c0_2] : memref<1x96xf32, #tpu.memory_space<vmem>>, vector<1x96xf32>
    %c0_3 = arith.constant 0 : index
    %c0_4 = arith.constant 0 : index
    %2 = vector.load %arg5[%c0_3, %c0_4] : memref<32x32xf32, #tpu.memory_space<vmem>>, vector<32x32xf32>
    %c0_5 = arith.constant 0 : index
    %c0_6 = arith.constant 0 : index
    %3 = vector.load %arg6[%c0_5, %c0_6] : memref<1x32xf32, #tpu.memory_space<vmem>>, vector<1x32xf32>
    %c0_7 = arith.constant 0 : index
    %c0_8 = arith.constant 0 : index
    %c0_9 = arith.constant 0 : index
    %4 = vector.load %arg1[%c0_7, %c0_8, %c0_9] : memref<1x24x32xf32, #tpu.memory_space<vmem>>, vector<1x24x32xf32>
    %5 = vector.shape_cast %4 : vector<1x24x32xf32> to vector<24x32xf32>
    %cst = arith.constant dense<0.000000e+00> : vector<24x96xf32>
    %6 = tpu.matmul %5, %0, %cst {dimension_numbers = #tpu.dot_dimension_numbers<[1], [0], [0], [1], [0, 0, 1, 1], [], []>} : vector<24x32xf32>, vector<32x96xf32>, vector<24x96xf32> -> vector<24x96xf32>
    %7 = vector.broadcast %1 : vector<1x96xf32> to vector<24x96xf32>
    %8 = arith.addf %6, %7 : vector<24x96xf32>
    %9 = vector.shape_cast %8 : vector<24x96xf32> to vector<1x24x96xf32>
    %10 = vector.extract_strided_slice %9 {offsets = [0, 0, 0], sizes = [1, 8, 32], strides = [1, 1, 1]} : vector<1x24x96xf32> to vector<1x8x32xf32>
    %11 = vector.shape_cast %10 : vector<1x8x32xf32> to vector<8x32xf32>
    %12 = vector.extract_strided_slice %9 {offsets = [0, 8, 32], sizes = [1, 8, 32], strides = [1, 1, 1]} : vector<1x24x96xf32> to vector<1x8x32xf32>
    %13 = vector.shape_cast %12 : vector<1x8x32xf32> to vector<8x32xf32>
    %14 = vector.extract_strided_slice %9 {offsets = [0, 16, 64], sizes = [1, 8, 32], strides = [1, 1, 1]} : vector<1x24x96xf32> to vector<1x8x32xf32>
    %15 = vector.shape_cast %14 : vector<1x8x32xf32> to vector<8x32xf32>
    %c0_10 = arith.constant 0 : index
    %c0_11 = arith.constant 0 : index
    %c0_12 = arith.constant 0 : index
    %16 = vector.load %arg2[%c0_10, %c0_11, %c0_12] : memref<1x8x8xf32, #tpu.memory_space<vmem>>, vector<1x8x8xf32>
    %17 = vector.shape_cast %16 : vector<1x8x8xf32> to vector<8x8xf32>
    %cst_13 = arith.constant 0.000000e+00 : f32
    %18 = vector.broadcast %cst_13 : f32 to vector<8x32xf32>
    %19 = vector.extract_strided_slice %15 {offsets = [0, 0], sizes = [8, 8], strides = [1, 1]} : vector<8x32xf32> to vector<8x8xf32>
    %20 = vector.extract_strided_slice %13 {offsets = [0, 0], sizes = [8, 8], strides = [1, 1]} : vector<8x32xf32> to vector<8x8xf32>
    %21 = vector.extract_strided_slice %11 {offsets = [0, 0], sizes = [8, 8], strides = [1, 1]} : vector<8x32xf32> to vector<8x8xf32>
    %cst_14 = arith.constant dense<0.000000e+00> : vector<8x8xf32>
    %22 = tpu.matmul %19, %20, %cst_14 {dimension_numbers = #tpu.dot_dimension_numbers<[1], [1], [0], [0], [0, 0, 1, 0], [], []>} : vector<8x8xf32>, vector<8x8xf32>, vector<8x8xf32> -> vector<8x8xf32>
    %23 = arith.addf %22, %17 : vector<8x8xf32>
    %cst_15 = arith.constant dense<0xFF800000> : vector<8xf32>
    %24 = vector.multi_reduction <maximumf>, %23, %cst_15 [1] : vector<8x8xf32> to vector<8xf32>
    %25 = vector.shape_cast %24 : vector<8xf32> to vector<8x1xf32>
    %26 = vector.broadcast %25 : vector<8x1xf32> to vector<8x8xf32>
    %27 = arith.subf %23, %26 : vector<8x8xf32>
    %28 = math.exp %27 : vector<8x8xf32>
    %cst_16 = arith.constant dense<0.000000e+00> : vector<8xf32>
    %29 = vector.multi_reduction <add>, %28, %cst_16 [1] : vector<8x8xf32> to vector<8xf32>
    %30 = vector.shape_cast %29 : vector<8xf32> to vector<8x1xf32>
    %31 = tpu.reciprocal %30 {approx = true} : vector<8x1xf32> -> vector<8x1xf32>
    %32 = vector.broadcast %31 : vector<8x1xf32> to vector<8x8xf32>
    %33 = arith.mulf %28, %32 : vector<8x8xf32>
    %cst_17 = arith.constant dense<0.000000e+00> : vector<8x8xf32>
    %34 = tpu.matmul %33, %21, %cst_17 {dimension_numbers = #tpu.dot_dimension_numbers<[1], [0], [0], [1], [0, 0, 1, 1], [], []>} : vector<8x8xf32>, vector<8x8xf32>, vector<8x8xf32> -> vector<8x8xf32>
    %35 = vector.extract_strided_slice %2 {offsets = [0, 0], sizes = [8, 32], strides = [1, 1]} : vector<32x32xf32> to vector<8x32xf32>
    %cst_18 = arith.constant dense<0.000000e+00> : vector<8x32xf32>
    %36 = tpu.matmul %34, %35, %cst_18 {dimension_numbers = #tpu.dot_dimension_numbers<[1], [0], [0], [1], [0, 0, 1, 1], [], []>} : vector<8x8xf32>, vector<8x32xf32>, vector<8x32xf32> -> vector<8x32xf32>
    %37 = arith.addf %18, %36 : vector<8x32xf32>
    %38 = vector.extract_strided_slice %15 {offsets = [0, 8], sizes = [8, 8], strides = [1, 1]} : vector<8x32xf32> to vector<8x8xf32>
    %39 = vector.extract_strided_slice %13 {offsets = [0, 8], sizes = [8, 8], strides = [1, 1]} : vector<8x32xf32> to vector<8x8xf32>
    %40 = vector.extract_strided_slice %11 {offsets = [0, 8], sizes = [8, 8], strides = [1, 1]} : vector<8x32xf32> to vector<8x8xf32>
    %cst_19 = arith.constant dense<0.000000e+00> : vector<8x8xf32>
    %41 = tpu.matmul %38, %39, %cst_19 {dimension_numbers = #tpu.dot_dimension_numbers<[1], [1], [0], [0], [0, 0, 1, 0], [], []>} : vector<8x8xf32>, vector<8x8xf32>, vector<8x8xf32> -> vector<8x8xf32>
    %42 = arith.addf %41, %17 : vector<8x8xf32>
    %cst_20 = arith.constant dense<0xFF800000> : vector<8xf32>
    %43 = vector.multi_reduction <maximumf>, %42, %cst_20 [1] : vector<8x8xf32> to vector<8xf32>
    %44 = vector.shape_cast %43 : vector<8xf32> to vector<8x1xf32>
    %45 = vector.broadcast %44 : vector<8x1xf32> to vector<8x8xf32>
    %46 = arith.subf %42, %45 : vector<8x8xf32>
    %47 = math.exp %46 : vector<8x8xf32>
    %cst_21 = arith.constant dense<0.000000e+00> : vector<8xf32>
    %48 = vector.multi_reduction <add>, %47, %cst_21 [1] : vector<8x8xf32> to vector<8xf32>
    %49 = vector.shape_cast %48 : vector<8xf32> to vector<8x1xf32>
    %50 = tpu.reciprocal %49 {approx = true} : vector<8x1xf32> -> vector<8x1xf32>
    %51 = vector.broadcast %50 : vector<8x1xf32> to vector<8x8xf32>
    %52 = arith.mulf %47, %51 : vector<8x8xf32>
    %cst_22 = arith.constant dense<0.000000e+00> : vector<8x8xf32>
    %53 = tpu.matmul %52, %40, %cst_22 {dimension_numbers = #tpu.dot_dimension_numbers<[1], [0], [0], [1], [0, 0, 1, 1], [], []>} : vector<8x8xf32>, vector<8x8xf32>, vector<8x8xf32> -> vector<8x8xf32>
    %54 = vector.extract_strided_slice %2 {offsets = [8, 0], sizes = [8, 32], strides = [1, 1]} : vector<32x32xf32> to vector<8x32xf32>
    %cst_23 = arith.constant dense<0.000000e+00> : vector<8x32xf32>
    %55 = tpu.matmul %53, %54, %cst_23 {dimension_numbers = #tpu.dot_dimension_numbers<[1], [0], [0], [1], [0, 0, 1, 1], [], []>} : vector<8x8xf32>, vector<8x32xf32>, vector<8x32xf32> -> vector<8x32xf32>
    %56 = arith.addf %37, %55 : vector<8x32xf32>
    %57 = vector.extract_strided_slice %15 {offsets = [0, 16], sizes = [8, 8], strides = [1, 1]} : vector<8x32xf32> to vector<8x8xf32>
    %58 = vector.extract_strided_slice %13 {offsets = [0, 16], sizes = [8, 8], strides = [1, 1]} : vector<8x32xf32> to vector<8x8xf32>
    %59 = vector.extract_strided_slice %11 {offsets = [0, 16], sizes = [8, 8], strides = [1, 1]} : vector<8x32xf32> to vector<8x8xf32>
    %cst_24 = arith.constant dense<0.000000e+00> : vector<8x8xf32>
    %60 = tpu.matmul %57, %58, %cst_24 {dimension_numbers = #tpu.dot_dimension_numbers<[1], [1], [0], [0], [0, 0, 1, 0], [], []>} : vector<8x8xf32>, vector<8x8xf32>, vector<8x8xf32> -> vector<8x8xf32>
    %61 = arith.addf %60, %17 : vector<8x8xf32>
    %cst_25 = arith.constant dense<0xFF800000> : vector<8xf32>
    %62 = vector.multi_reduction <maximumf>, %61, %cst_25 [1] : vector<8x8xf32> to vector<8xf32>
    %63 = vector.shape_cast %62 : vector<8xf32> to vector<8x1xf32>
    %64 = vector.broadcast %63 : vector<8x1xf32> to vector<8x8xf32>
    %65 = arith.subf %61, %64 : vector<8x8xf32>
    %66 = math.exp %65 : vector<8x8xf32>
    %cst_26 = arith.constant dense<0.000000e+00> : vector<8xf32>
    %67 = vector.multi_reduction <add>, %66, %cst_26 [1] : vector<8x8xf32> to vector<8xf32>
    %68 = vector.shape_cast %67 : vector<8xf32> to vector<8x1xf32>
    %69 = tpu.reciprocal %68 {approx = true} : vector<8x1xf32> -> vector<8x1xf32>
    %70 = vector.broadcast %69 : vector<8x1xf32> to vector<8x8xf32>
    %71 = arith.mulf %66, %70 : vector<8x8xf32>
    %cst_27 = arith.constant dense<0.000000e+00> : vector<8x8xf32>
    %72 = tpu.matmul %71, %59, %cst_27 {dimension_numbers = #tpu.dot_dimension_numbers<[1], [0], [0], [1], [0, 0, 1, 1], [], []>} : vector<8x8xf32>, vector<8x8xf32>, vector<8x8xf32> -> vector<8x8xf32>
    %73 = vector.extract_strided_slice %2 {offsets = [16, 0], sizes = [8, 32], strides = [1, 1]} : vector<32x32xf32> to vector<8x32xf32>
    %cst_28 = arith.constant dense<0.000000e+00> : vector<8x32xf32>
    %74 = tpu.matmul %72, %73, %cst_28 {dimension_numbers = #tpu.dot_dimension_numbers<[1], [0], [0], [1], [0, 0, 1, 1], [], []>} : vector<8x8xf32>, vector<8x32xf32>, vector<8x32xf32> -> vector<8x32xf32>
    %75 = arith.addf %56, %74 : vector<8x32xf32>
    %76 = vector.extract_strided_slice %15 {offsets = [0, 24], sizes = [8, 8], strides = [1, 1]} : vector<8x32xf32> to vector<8x8xf32>
    %77 = vector.extract_strided_slice %13 {offsets = [0, 24], sizes = [8, 8], strides = [1, 1]} : vector<8x32xf32> to vector<8x8xf32>
    %78 = vector.extract_strided_slice %11 {offsets = [0, 24], sizes = [8, 8], strides = [1, 1]} : vector<8x32xf32> to vector<8x8xf32>
    %cst_29 = arith.constant dense<0.000000e+00> : vector<8x8xf32>
    %79 = tpu.matmul %76, %77, %cst_29 {dimension_numbers = #tpu.dot_dimension_numbers<[1], [1], [0], [0], [0, 0, 1, 0], [], []>} : vector<8x8xf32>, vector<8x8xf32>, vector<8x8xf32> -> vector<8x8xf32>
    %80 = arith.addf %79, %17 : vector<8x8xf32>
    %cst_30 = arith.constant dense<0xFF800000> : vector<8xf32>
    %81 = vector.multi_reduction <maximumf>, %80, %cst_30 [1] : vector<8x8xf32> to vector<8xf32>
    %82 = vector.shape_cast %81 : vector<8xf32> to vector<8x1xf32>
    %83 = vector.broadcast %82 : vector<8x1xf32> to vector<8x8xf32>
    %84 = arith.subf %80, %83 : vector<8x8xf32>
    %85 = math.exp %84 : vector<8x8xf32>
    %cst_31 = arith.constant dense<0.000000e+00> : vector<8xf32>
    %86 = vector.multi_reduction <add>, %85, %cst_31 [1] : vector<8x8xf32> to vector<8xf32>
    %87 = vector.shape_cast %86 : vector<8xf32> to vector<8x1xf32>
    %88 = tpu.reciprocal %87 {approx = true} : vector<8x1xf32> -> vector<8x1xf32>
    %89 = vector.broadcast %88 : vector<8x1xf32> to vector<8x8xf32>
    %90 = arith.mulf %85, %89 : vector<8x8xf32>
    %cst_32 = arith.constant dense<0.000000e+00> : vector<8x8xf32>
    %91 = tpu.matmul %90, %78, %cst_32 {dimension_numbers = #tpu.dot_dimension_numbers<[1], [0], [0], [1], [0, 0, 1, 1], [], []>} : vector<8x8xf32>, vector<8x8xf32>, vector<8x8xf32> -> vector<8x8xf32>
    %92 = vector.extract_strided_slice %2 {offsets = [24, 0], sizes = [8, 32], strides = [1, 1]} : vector<32x32xf32> to vector<8x32xf32>
    %cst_33 = arith.constant dense<0.000000e+00> : vector<8x32xf32>
    %93 = tpu.matmul %91, %92, %cst_33 {dimension_numbers = #tpu.dot_dimension_numbers<[1], [0], [0], [1], [0, 0, 1, 1], [], []>} : vector<8x8xf32>, vector<8x32xf32>, vector<8x32xf32> -> vector<8x32xf32>
    %94 = arith.addf %75, %93 : vector<8x32xf32>
    %95 = vector.broadcast %3 : vector<1x32xf32> to vector<8x32xf32>
    %96 = arith.addf %94, %95 : vector<8x32xf32>
    %c0_34 = arith.constant 0 : index
    %c0_35 = arith.constant 0 : index
    %c0_36 = arith.constant 0 : index
    %97 = vector.load %arg7[%c0_34, %c0_35, %c0_36] : memref<1x8x32xf32, #tpu.memory_space<vmem>>, vector<1x8x32xf32>
    %98 = vector.shape_cast %97 : vector<1x8x32xf32> to vector<8x32xf32>
    %99 = vector.shape_cast %96 : vector<8x32xf32> to vector<1x8x32xf32>
    tpu.vector_store %arg7[%c0_34, %c0_35, %c0_36], %99 {strides = array<i32>} : memref<1x8x32xf32, #tpu.memory_space<vmem>>, vector<1x8x32xf32>,
    return
  }
  func.func @transform_0(%arg0: i32) -> (i32, i32, i32) {
    %c0_i32 = arith.constant 0 : i32
    %c0_i32_0 = arith.constant 0 : i32
    %c0_i32_1 = arith.constant 0 : i32
    return %arg0, %c0_i32, %c0_i32_0 : i32, i32, i32
  }
  func.func @transform_1(%arg0: i32) -> (i32, i32, i32) {
    %c0_i32 = arith.constant 0 : i32
    %c0_i32_0 = arith.constant 0 : i32
    %c0_i32_1 = arith.constant 0 : i32
    return %arg0, %c0_i32, %c0_i32_0 : i32, i32, i32
  }
  func.func @transform_2(%arg0: i32) -> (i32, i32) {
    %c0_i32 = arith.constant 0 : i32
    %c0_i32_0 = arith.constant 0 : i32
    %c0_i32_1 = arith.constant 0 : i32
    return %c0_i32, %c0_i32_0 : i32, i32
  }
  func.func @transform_3(%arg0: i32) -> (i32, i32) {
    %c0_i32 = arith.constant 0 : i32
    %c0_i32_0 = arith.constant 0 : i32
    %c0_i32_1 = arith.constant 0 : i32
    return %c0_i32, %c0_i32_0 : i32, i32
  }
  func.func @transform_4(%arg0: i32) -> (i32, i32) {
    %c0_i32 = arith.constant 0 : i32
    %c0_i32_0 = arith.constant 0 : i32
    %c0_i32_1 = arith.constant 0 : i32
    return %c0_i32, %c0_i32_0 : i32, i32
  }
  func.func @transform_5(%arg0: i32) -> (i32, i32) {
    %c0_i32 = arith.constant 0 : i32
    %c0_i32_0 = arith.constant 0 : i32
    %c0_i32_1 = arith.constant 0 : i32
    return %c0_i32, %c0_i32_0 : i32, i32
  }
  func.func @transform_6(%arg0: i32) -> (i32, i32, i32) {
    %c0_i32 = arith.constant 0 : i32
    %c0_i32_0 = arith.constant 0 : i32
    %c0_i32_1 = arith.constant 0 : i32
    return %arg0, %c0_i32, %c0_i32_0 : i32, i32, i32
  }
}

</mosaic_0001>

<bundles_post_ra>
// kernel: tpu_custom_call.1
= control target key start
LH: loop header
LB: loop body
LE: loop exit
PB: predicated region body
PF: predicated region fallthrough
CT: control target
= control target key end

     0   :  { %s2377_s0 = inlined_call_operand.hbm [shape: f32[2,24,32], index: 0, kind: input, shape index: {}]   ;;  %s2378_s1 = inlined_call_operand.hbm [shape: f32[2,8,8], index: 1, kind: input, shape index: {}]   ;;  %s2379_s2 = inlined_call_operand.hbm [shape: f32[32,96], index: 2, kind: input, shape index: {}]   ;;  %s2380_s3 = inlined_call_operand.vmem [shape: f32[1,96], index: 3, kind: input, shape index: {}]   ;;  %s2381_s4 = inlined_call_operand.hbm [shape: f32[32,32], index: 4, kind: input, shape index: {}]   ;;  %s2382_s5 = inlined_call_operand.vmem [shape: f32[1,32], index: 5, kind: input, shape index: {}]   ;;  %s2383_s6 = inlined_call_operand.hbm [shape: f32[2,8,32], index: 6, kind: output, shape index: {}]  }
   0x1   :  { %2390 = sst [smem:[#allocation17_spill]] %s2377_s0 }
   0x2   :  { %2391 = sst [smem:[#allocation18_spill]] %s2379_s2 }
   0x3   :  { %2392 = sst [smem:[#allocation19_spill]] %s2381_s4 }
   0x4   :  { %11 = vsyncpa [#allocation3], 0 }
   0x5   :  { %13 = vsyncpa [#allocation3 + $0x1], 0 }
   0x6   :  { %14 = vsyncpa [#allocation6], 0 }
   0x7   :  { %16 = vsyncpa [#allocation6 + $0x1], 0 }
   0x8   :  { %17 = vsyncpa [#allocation9], 0 }
   0x9   :  { %18 = vsyncpa [#allocation4], 0 }
   0xa   :  { %20 = vsyncpa [#allocation4 + $0x1], 0  ;;  %s2028_s21 = smov 0   ;;  %s2030_s22 = smov 0  }
   0xb   :  { %s2032_s23 = smov 0   ;;  %s2034_s24 = smov 0  }
   0xc LB: > { %s2049_s25 = sadd.s32 4294967295, %s1971_s24   ;;  %s1535_s26 = sadd.s32 4294967294, %s1971_s24   ;;  %s1971_s24 = sphi %s2034_s24, %s2419_s24   ;;  %s1967_s23 = sphi %s2032_s23, %s2418_s23   ;;  %s1963_s22 = sphi %s2030_s22, %s2417_s22   ;;  %s1959_s21 = sphi %s2028_s21, %s2416_s21  }
   0xd   : > { %p46_p0 = scmp.ne.s32.totalorder %s1963_s22, %s1959_s21  ;;  %p2386_p1 = scmp.eq.s32.totalorder %s2049_s25, 0 }
   0xe   : > { %p180_p2 = scmp.eq.s32.totalorder %s2049_s25, 1  ;;  %p186_p3 = scmp.eq.s32.totalorder %s1535_s26, 1 }
   0xf   : > { %p2058_p4 = por %p2386_p1, %p46_p0  ;;  %p1536_p5 = scmp.ge.s32.totalorder %s1971_s24, 1 }
  0x10   : > { %p2063_p6 = por %p186_p3, %p46_p0  ;;  %p193_p7 = scmp.lt.s32.totalorder %s1971_s24, 3 }
  0x11   : > { %s2393_s27 = scalar_select %p2058_p4, 1, 0 }
  0x12   : > { %s2394_s28 = scalar_select %p2063_p6, 1, 0 }
  0x13   : > { %p2068_p8 = pnand %p1536_p5, %p193_p7  ;;  %s1973_s30 = smov [#allocation7]  }
  0x14   : > { %s205_s7 = sshll.u32 %s1973_s30, 4  ;;  %s1974_s9 = smov [#allocation8]   ;;  %s206_s7 = int_to_ptr.vmem [resolvable:$true] %s205_s7 }
  0x15   : > { %s2395_s29 = scalar_select %p2068_p8, 1, 0 }
  0x16   : > { %p1698_p9 = pneg %p2068_p8  ;;  %s221_s10 = sshll.u32 %s1974_s9, 4  ;;  %s222_s10 = int_to_ptr.vmem [resolvable:$true] %s221_s10 }
  0x17   : > { %s1798_s11 = scalar_lea.vmem %s206_s7, 512  ;;  %p1806_p5 = scmp.lt.s32.totalorder %s206_s7, %s206_s7 }
  0x18   : > { %p2077_p11 = pnand %p1698_p9, %p2386_p1  ;;  %p1799_p13 = scmp.ne.s32.totalorder %s206_s7, %s1798_s11 }
  0x19   : > { %p1807_p7 = scmp.lt.s32.totalorder %s1798_s11, %s1798_s11 }
  0x1a   : > { %p1789_p12 = pneg %p2077_p11 }
  0x1b   : > { %p1808_p10 = por %p1807_p7, %p1806_p5 }
  0x1c   : > { %p1801_p0 = pnand %p1799_p13, %p1789_p12 }
  0x1e   : > { %p1802_p3 = pneg %p1801_p0 }
  0x20   : > { %p1809_p9 = pnand %p1808_p10, %p1802_p3 }
  0x22   : > { %1812 = shalt.err (!%p1809_p9)
}
  0x23   : > { %s2384_s12 = smov 128   ;;  %s2385_s13 = smov 8  }
  0x24   : > { %s2397_s2 = sld [smem:[#allocation18_spill]]  ;;  %s1824_s16 = scalar_lea.vmem %s222_s10, 512 }
  0x25   : > { %p1825_p13 = scmp.ne.s32.totalorder %s222_s10, %s1824_s16  ;;  %p1832_p10 = scmp.lt.s32.totalorder %s222_s10, %s222_s10 }
  0x26   : > { %p1833_p3 = scmp.lt.s32.totalorder %s1824_s16, %s1824_s16 }
  0x27   : > { %p1827_p0 = pnand %p1825_p13, %p1789_p12 }
  0x28   : > { %p1834_p7 = por %p1833_p3, %p1832_p10 }
  0x29   : > { %p1828_p5 = pneg %p1827_p0 }
  0x2a   : > { %1701 = dma.hbm_to_vmem [thread:$0]  (!%p2077_p11), %s2397_s2, 512, %s206_s7, [#allocation6], %s2384_s12, %s2384_s12, %s2385_s13  }
  0x2b   : > { %p1835_p9 = pnand %p1834_p7, %p1828_p5 }
  0x2d   : > { %1838 = shalt.err (!%p1835_p9)
}
  0x2e   : > { %s2398_s4 = sld [smem:[#allocation19_spill]]  ;;  %s2106_s19 = sadd.s32 1, %s1971_s24  }
  0x2f   : > { %s33_s20 = sadd.s32 1, %s1967_s23  ;;  %s30_s26 = ssub.s32 %s1971_s24, %s2106_s19 }
  0x30   : > { %p40_p12 = scmp.ne.s32.totalorder %s1967_s23, %s1963_s22  ;;  %p31_p13 = scmp.eq.s32.totalorder %s30_s26, 0 }
  0x31   : > { %p41_p0 = scmp.eq.s32.totalorder %s1971_s24, 0  ;;  %p1718_p10 = scmp.lt.s32.totalorder %s1971_s24, 2 }
  0x32   : > { %p2116_p5 = por %p180_p2, %p40_p12  ;;  %s2125_s8 = sand.u32 1, %s1967_s23  }
  0x33   : > { %s2122_s7 = scalar_select %p31_p13, %s1967_s23, %s33_s20  }
  0x34   : > { %1704 = dma.hbm_to_vmem [thread:$0]  (!%p2077_p11), %s2398_s4, 512, %s222_s10, [#allocation9], %s2384_s12, %s2384_s12, %s2385_s13  }
  0x35   : > { %s2399_s30 = scalar_select %p2116_p5, 1, 0 }
  0x36   : > { %2400 = sst [smem:[#allocation16_spill]] %s2122_s7  ;;  %p42_p3 = por %p41_p0, %p40_p12 }
  0x37   : > { %s1681_s9 = smul.u32 24, %s2125_s8  ;;  %s2402_s0 = sld [smem:[#allocation17_spill]] }
  0x38   : > { %s1682_s10 = smul.u32 384, %s1971_s24  ;;  %p2129_p11 = pnand %p1718_p10, %p42_p3 }
  0x39   : > { %s242_s18 = scalar_lea.vmem [#allocation2], %s1681_s9  ;;  %s239_s26 = scalar_lea.sflag [#allocation3], %s2125_s8 }
  0x3a   : > { %s249_s20 = sshll.u32 %s242_s18, 4  ;;  %p1841_p7 = pneg %p2129_p11  ;;  %s2139_s20 = int_to_ptr.vmem [resolvable:$true] %s249_s20 }
  0x3d   : > { %s2137_s17 = scalar_lea.hbm %s2402_s0, %s1682_s10  ;;  %s1844_s10 = scalar_lea.hbm %s2402_s0, 768 }
  0x3e   : > { %s1839_s12 = scalar_lea.hbm %s2137_s17, 384  ;;  %p1845_p13 = scmp.lt.s32.totalorder %s2137_s17, %s2402_s0 }
  0x3f   : > { %p1840_p2 = scmp.ne.s32.totalorder %s2137_s17, %s1839_s12  ;;  %p1846_p0 = scmp.lt.s32.totalorder %s1844_s10, %s1839_s12 }
  0x41   : > { %p1842_p9 = pnand %p1841_p7, %p1840_p2  ;;  %p1847_p10 = por %p1846_p0, %p1845_p13 }
  0x43   : > { %p1843_p12 = pneg %p1842_p9 }
  0x45   : > { %p1848_p3 = pnand %p1847_p10, %p1843_p12 }
  0x47   : > { %1851 = shalt.err (!%p1848_p3)
}
  0x48   : > { %s1852_s9 = scalar_lea.vmem %s2139_s20, 384  ;;  %s1977_s14 = smov [#allocation2]  }
  0x49   : > { %p1853_p1 = scmp.ne.s32.totalorder %s2139_s20, %s1852_s9  ;;  %s1857_s18 = sshll.u32 %s1977_s14, 4  ;;  %s1858_s18 = int_to_ptr.vmem [resolvable:$false] %s1857_s18 }
  0x4a   : > { %s1859_s15 = scalar_lea.vmem %s1858_s18, 768  ;;  %p1860_p6 = scmp.lt.s32.totalorder %s2139_s20, %s1858_s18 }
  0x4b   : > { %p1855_p2 = pnand %p1853_p1, %p1841_p7  ;;  %p1861_p5 = scmp.lt.s32.totalorder %s1859_s15, %s1852_s9 }
  0x4d   : > { %p1856_p9 = pneg %p1855_p2  ;;  %p1862_p4 = por %p1861_p5, %p1860_p6 }
  0x4f   : > { %p1863_p13 = pnand %p1862_p4, %p1856_p9 }
  0x51   : > { %1866 = shalt.err (!%p1863_p13)
}
  0x52   : > { %s2403_s12 = smov 8   ;;  %s2404_s13 = smov 128  }
  0x53   : > { %1708 = dma.hbm_to_vmem [thread:$0]  (!%p2129_p11), %s2137_s17, 384, %s2139_s20, %s239_s26, %s2404_s13, %s2404_s13, %s2403_s12  }
  0x54   : > { %s1541_s10 = sshll.u32 %s2125_s8, 3  ;;  %s1542_s16 = sshll.u32 %s1971_s24, 7 }
  0x55   : > { %s2176_s18 = scalar_lea.hbm %s2378_s1, %s1542_s16  ;;  %s263_s15 = scalar_lea.vmem [#allocation5], %s1541_s10 }
  0x56   : > { %s270_s0 = sshll.u32 %s263_s15, 4  ;;  %s2405_s2 = sand.u32 1, %s1971_s24   ;;  %s271_s0 = int_to_ptr.vmem [resolvable:$true] %s270_s0 }
  0x57   : > { %s260_s4 = scalar_lea.sflag [#allocation6], %s2405_s2  ;;  %s1867_s7 = scalar_lea.hbm %s2176_s18, 128 }
  0x58   : > { %p1868_p1 = scmp.ne.s32.totalorder %s2176_s18, %s1867_s7  ;;  %s1872_s20 = scalar_lea.hbm %s2378_s1, 256 }
  0x59   : > { %p1873_p5 = scmp.lt.s32.totalorder %s2176_s18, %s2378_s1  ;;  %p1874_p12 = scmp.lt.s32.totalorder %s1872_s20, %s1867_s7 }
  0x5a   : > { %p1870_p4 = pnand %p1868_p1, %p1841_p7 }
  0x5b   : > { %p1875_p0 = por %p1874_p12, %p1873_p5 }
  0x5c   : > { %p1871_p6 = pneg %p1870_p4 }
  0x5e   : > { %p1876_p10 = pnand %p1875_p0, %p1871_p6 }
  0x60   : > { %1879 = shalt.err (!%p1876_p10)
}
  0x61   : > { %s1880_s13 = scalar_lea.vmem %s271_s0, 128  ;;  %s1978_s2 = smov [#allocation5]  }
  0x62   : > { %p1881_p3 = scmp.ne.s32.totalorder %s271_s0, %s1880_s13  ;;  %s1885_s10 = sshll.u32 %s1978_s2, 4  ;;  %s1886_s10 = int_to_ptr.vmem [resolvable:$false] %s1885_s10 }
  0x63   : > { %s1887_s16 = scalar_lea.vmem %s1886_s10, 256  ;;  %p1888_p13 = scmp.lt.s32.totalorder %s271_s0, %s1886_s10 }
  0x64   : > { %p1883_p2 = pnand %p1881_p3, %p1841_p7  ;;  %p1889_p1 = scmp.lt.s32.totalorder %s1887_s16, %s1880_s13 }
  0x66   : > { %p1884_p9 = pneg %p1883_p2  ;;  %p1890_p4 = por %p1889_p1, %p1888_p13 }
  0x68   : > { %p1891_p8 = pnand %p1890_p4, %p1884_p9 }
  0x6a   : > { %1894 = shalt.err (!%p1891_p8)
}
  0x6b   : > { %1711 = dma.hbm_to_vmem [thread:$0]  (!%p2129_p11), %s2176_s18, 128, %s271_s0, %s260_s4  }
  0x6c   : > { %p2406_p6 = scmp.ne.s32.totalorder %s2395_s29, 0 }
  0x6d   : > { %s2201_s7 = sand.u32 (!%p2406_p6), 1, %s1963_s22   ;;  %p2407_p7 = scmp.ne.s32.totalorder (!%p2406_p6), %s2393_s27, 0 }
  0x6e   : > { %279 = sbr.rel (%p2406_p6) target bundleno = 3089 (0xc11), region = 44  ;;  %s282_s14 = scalar_lea.sflag (!%p2406_p6), [#allocation3], %s2201_s7 }
  0x6f   : > { %s1683_s9 = smul.u32 (!%p2406_p6), 24, %s2201_s7 }
  0x71   : > { %s2205_s15 = scalar_lea.vmem (!%p2406_p6), [#allocation2], %s1683_s9 }
  0x73   : > { %1938 = dma.done.wait (%p2407_p7), %s282_s14, 384  }
  0x74   : > { %1940 = vsyncadd (%p2407_p7), %s282_s14, 4294966912  ;;  %s290_s0 = sand.u32 1, %s2049_s25   ;;  %s1544_s4 = sshll.u32 %s2201_s7, 3 }
  0x75   : > { %s291_s29 = scalar_lea.sflag [#allocation6], %s290_s0  ;;  %s2215_s11 = scalar_lea.vmem [#allocation5], %s1544_s4 }
  0x76   : > { %1942 = dma.done.wait (%p2407_p7), %s291_s29, 128  }
  0x77   : > { %1944 = vsyncadd (%p2407_p7), %s291_s29, 4294967168  ;;  %p2408_p8 = scmp.eq.s32.totalorder %s2049_s25, 0 }
  0x79   : > { %1946 = dma.done.wait (%p2408_p8), [#allocation6], 512   ;;  %p2409_p11 = pmov %p2408_p8 }
  0x7a   : > { %p2410_p5 = pmov %p2408_p8 }
  0x7b   : > { %1948 = vsyncadd (%p2409_p11), [#allocation6], 4294966784 }
  0x7c   : > { %1950 = dma.done.wait (%p2410_p5), [#allocation9], 512   ;;  %p2411_p12 = pmov %p2410_p5 }
  0x7d   : > { %v1979_v0 = vmov 0.0   ;;  %vm1980_vm0 = vmmov 0   ;;  %v339_v1 = vld [vmem:[#allocation7 + $0x18] sm:$0xff]  ;;  %v338_v2 = vld [vmem:[#allocation7 + $0x10] sm:$0xff]  ;;  %v337_v3 = vld [vmem:[#allocation7 + $0x8] sm:$0xff]  ;;  %vm355_vm1 = vcmask 261120  }
  0x7e   : > { %1952 = vsyncadd (%p2411_p12), [#allocation9], 4294966784  ;;  %1604 = vmatprep.subr.mxu0 %v1979_v0  ;;  %1612 = vmatprep.mubr.msk.f32.mxu0 %vm1980_vm0, %v1979_v0  ;;  %v336_v4 = vld [vmem:[#allocation7] sm:$0xff]  ;;  %v348_v7 = vld [vmem:[%s2205_s15 + $0x10] sm:$0xff]  ;;  %s1981_s8 = smov 96   ;;  %s1982_s17 = smov 64  }
  0x7f   : > { %1621 = vmatprep.subr.mxu1 %v1979_v0  ;;  %1623 = vmatprep.mubr.msk.f32.mxu1 %vm1980_vm0, %v1979_v0  ;;  %v346_v5 = vld [vmem:[%s2205_s15] sm:$0xff]  ;;  %v347_v6 = vld [vmem:[%s2205_s15 + $0x8] sm:$0xff]  ;;  %s1983_s20 = smov 88   ;;  %vm452_vm2 = vcmask 64512   ;;  %s1984_s26 = smov 56  }
  0x80   : > { %1605 = vmatpush3.msra.mxu0 %v339_v1  ;;  %v1548_v8 = vld [vmem:[%s2380_s3] ss:$0 sm:$0xff]  ;;  %v2271_v20 = vld [vmem:[%s2215_s11] sm:$0xff]  ;;  %s1985_s12 = smov 120   ;;  %s1986_s13 = smov 48   ;;  %v342_v47 = vld [vmem:[#allocation8 + $0x8] sm:$0xff] }
  0x81   : > { %1606 = vmatprep.subr.mxu0 %v1979_v0  ;;  %s1987_s2 = smov 80   ;;  %v341_v51 = vld [vmem:[#allocation8] sm:$0xff]  ;;  %s1988_s10 = smov 112  }
  0x82   : > { %1607 = vmatpush3.msra.mxu0 %v338_v2  ;;  %s1989_s16 = smov 40   ;;  %s1990_s9 = smov 72  }
  0x83   : > { %1608 = vmatprep.subr.mxu0 %v1979_v0  ;;  %s1991_s14 = smov 104   ;;  %s1570_s29 = sshll.u32 %s2049_s25, 7 }
  0x84   : > { %1609 = vmatpush3.msra.mxu0 %v337_v3  ;;  %s335_s11 = scalar_lea.vmem [#allocation10], %s1544_s4  ;;  %p2412_p10 = scmp.ne.s32.totalorder %s2399_s30, 0 }
  0x85   : > { %1610 = vmatprep.subr.mxu0 %v1979_v0  ;;  %s1423_s27 = sshll.u32 %s335_s11, 4  ;;  %s1992_s25 = smov [#allocation10]   ;;  %s1424_s27 = int_to_ptr.vmem [resolvable:$true] %s1423_s27 }
  0x86   : > { %1611 = vmatpush3.msra.mxu0 %v336_v4 }
  0x87   : > { %1613 = vmatmul.mubr.msk.f32.vlgmr.msra.gmra.mxu0 %vm355_vm1, %v346_v5  ;;  %1641 = vmatprep.subr.mxu0 %v1979_v0 }
  0x88   : > { %1615 = vmatprep.mubr.msk.f32.mxu0 %vm1980_vm0, %v1979_v0  ;;  %1642 = vmatpush3.msra.mxu0 %v342_v47 }
  0x89   : > { %1651 = vmatprep.subr.mxu0 %v1979_v0 }
  0x8b   : > { %1616 = vmatmul.mubr.msk.f32.gmra.mxu0 %vm355_vm1, %v347_v6 }
  0x8c   : > { %1618 = vmatprep.mubr.msk.f32.mxu0 %vm1980_vm0, %v1979_v0 }
  0x8f   : > { %1619 = vmatmul.mubr.msk.f32.gmra.mxu0 %vm355_vm1, %v348_v7 }
  0x90   : > { %1643 = vmatprep.mubr.msk.f32.mxu0 %vm1980_vm0, %v1979_v0 }
 0x147   : > { %v431_v9 = vpop.f32.mrf.mxu0 }
 0x148   : > { %v2254_v10 = vadd.f32 %v1548_v8, %v431_v9 }
 0x149   : > { %v1614_v11 = vpop.f32.mrf.mxu0 }
 0x14b   : > { %v436_v12 = vpop.f32.mrf.mxu0 }
 0x14c   : > { %v2256_v13 = vadd.f32 %v1548_v8, %v436_v12 }
 0x14d   : > { %v1617_v14 = vpop.f32.mrf.mxu0 }
 0x14e   : > { %450 = vrot.lane.b32.xlu0 %v2256_v13, %s1981_s8 }
 0x14f   : > { %v441_v15 = vpop.f32.mrf.mxu0 }
 0x150   : > { %v2259_v16 = vadd.f32 %v1548_v8, %v441_v15 }
 0x151   : > { %v1620_v17 = vpop.f32.mrf.mxu0 }
 0x152   : > { %447 = vrot.lane.b32.xlu0 %v2259_v16, %s1982_s17  ;;  %s1421_s17 = scalar_lea.hbm %s2383_s6, %s1570_s29 }
 0x156   : > { %613 = vrot.lane.b32.xlu0 %v2256_v13, %s1983_s20  ;;  %s1410_s20 = scalar_lea.sflag [#allocation4], %s2201_s7 }
 0x1c0   : > { %v451_v18 = vpop.permute.xlu0 %450 }
 0x1c1   : > { %1622 = vmatpush3.xpose.msk.msra.mxu1 %vm452_vm2, %v451_v18 }
 0x1c2   : > { %1626 = vmatprep.subr.mxu1 %v1979_v0 }
 0x1c4   : > { %v448_v19 = vpop.permute.xlu0 %447 }
 0x1c5   : > { %1624 = vmatmul.mubr.msk.f32.vlgmr.msra.gmra.mxu1 %vm452_vm2, %v448_v19 }
 0x1c6   : > { %1627 = vmatpush3.msra.mxu1 %v2254_v10  ;;  %1628 = vmatprep.mubr.msk.f32.mxu1 %vm1980_vm0, %v1979_v0 }
 0x1c7   : > { %1631 = vmatprep.subr.mxu1 %v1979_v0 }
 0x1c8   : > { %v614_v33 = vpop.permute.xlu0 %613 }
 0x285   : > { %v523_v21 = vpop.f32.mrf.mxu1 }
 0x286   : > { %v524_v22 = vadd.f32 %v523_v21, %v2271_v20 }
 0x287   : > { %v1625_v23 = vpop.f32.mrf.mxu1 }
 0x288   : > { %v527_v24 = vsel %vm452_vm2, %v524_v22, -inf }
 0x289   : > { %528 = vmax.xlane.f32.xlu1 %v527_v24 }
 0x312   : > { %v529_v25 = vpop.xlane.xlu1 %528 }
 0x313   : > { %v530_v26 = vsub.f32 %v524_v22, %v529_v25 }
 0x315   : > { %v531_v27 = vmul.f32 1.442695, %v530_v26 }
 0x317   : > { %1771 = vpow2.f32 %v531_v27 }
 0x324   : > { %v1772_v28 = vpop.eup %1771 }
 0x325   : > { %v533_v29 = vsel %vm452_vm2, %v1772_v28, 0.0 }
 0x326   : > { %534 = vadd.xlane.f32.xlu1 %v533_v29 }
 0x337   : > { %611 = vrot.lane.b32.xlu1 %v2259_v16, %s1984_s26  ;;  %s1895_s26 = scalar_lea.vmem %s1424_s27, 128 }
 0x338   : > { %p1896_p0 = scmp.ne.s32.totalorder %s1424_s27, %s1895_s26 }
 0x33a   : > { %p1897_p3 = pnand %p1896_p0, %p2412_p10 }
 0x33c   : > { %p1898_p2 = pneg %p1897_p3 }
 0x3af   : > { %v535_v30 = vpop.xlane.xlu1 %534 }
 0x3b0   : > { %1773 = vrcp.f32 %v535_v30 }
 0x3b3   : > { %v612_v34 = vpop.permute.xlu1 %611 }
 0x3bd   : > { %v1774_v31 = vpop.eup %1773 }
 0x3be   : > { %v537_v32 = vmul.f32 %v1774_v31, %v1772_v28 }
 0x3c0   : > { %1629 = vmatmul.mubr.msk.f32.vlgmr.msra.gmra.mxu1 %vm452_vm2, %v537_v32 }
 0x3c1   : > { %1632 = vmatpush3.xpose.msk.msra.mxu1 %vm452_vm2, %v614_v33  ;;  %1633 = vmatprep.mubr.msk.f32.mxu1 %vm1980_vm0, %v1979_v0 }
 0x3c2   : > { %1636 = vmatprep.subr.mxu1 %v1979_v0 }
 0x3c4   : > { %1634 = vmatmul.mubr.msk.f32.vlgmr.msra.gmra.mxu1 %vm452_vm2, %v612_v34  ;;  %v1568_v34 = vld [vmem:[%s2382_s5] ss:$0 sm:$0xff] }
 0x3c5   : > { %1638 = vmatprep.mubr.msk.f32.mxu1 %vm1980_vm0, %v1979_v0 }
 0x480   : > { %v607_v35 = vpop.f32.mrf.mxu1 }
 0x482   : > { %v1630_v36 = vpop.f32.mrf.mxu1 }
 0x484   : > { %v685_v37 = vpop.f32.mrf.mxu1 }
 0x485   : > { %v686_v38 = vadd.f32 %v685_v37, %v2271_v20 }
 0x486   : > { %v1635_v39 = vpop.f32.mrf.mxu1 }
 0x487   : > { %v689_v40 = vsel %vm452_vm2, %v686_v38, -inf }
 0x488   : > { %690 = vmax.xlane.f32.xlu0 %v689_v40 }
 0x49e   : > { %701 = vrot.lane.b32.xlu0 %v2254_v10, %s1985_s12  ;;  %s1899_s12 = sshll.u32 %s1992_s25, 4  ;;  %s1900_s12 = int_to_ptr.vmem [resolvable:$false] %s1899_s12 }
 0x49f   : > { %s1901_s4 = scalar_lea.vmem %s1900_s12, 256  ;;  %p1902_p9 = scmp.lt.s32.totalorder %s1424_s27, %s1900_s12 }
 0x4a0   : > { %p1903_p13 = scmp.lt.s32.totalorder %s1901_s4, %s1895_s26 }
 0x4a2   : > { %923 = vrot.lane.b32.xlu0 %v2259_v16, %s1986_s13  ;;  %p1904_p1 = por %p1903_p13, %p1902_p9 }
 0x4a4   : > { %p1905_p4 = pnand %p1904_p1, %p1898_p2 }
 0x511   : > { %v691_v41 = vpop.xlane.xlu0 %690 }
 0x512   : > { %v692_v42 = vsub.f32 %v686_v38, %v691_v41 }
 0x514   : > { %v693_v43 = vmul.f32 1.442695, %v692_v42 }
 0x515   : > { %v702_v44 = vpop.permute.xlu0 %701 }
 0x516   : > { %1775 = vpow2.f32 %v693_v43  ;;  %1637 = vmatpush3.msra.mxu1 %v702_v44 }
 0x517   : > { %1646 = vmatprep.subr.mxu1 %v1979_v0 }
 0x519   : > { %v924_v55 = vpop.permute.xlu0 %923 }
 0x523   : > { %v1776_v45 = vpop.eup %1775 }
 0x524   : > { %v695_v46 = vsel %vm452_vm2, %v1776_v45, 0.0 }
 0x525   : > { %696 = vadd.xlane.f32.xlu1 %v695_v46 }
 0x536   : > { %925 = vrot.lane.b32.xlu1 %v2256_v13, %s1987_s2 }
 0x5ae   : > { %v697_v48 = vpop.xlane.xlu1 %696 }
 0x5af   : > { %1777 = vrcp.f32 %v697_v48 }
 0x5b2   : > { %v926_v53 = vpop.permute.xlu1 %925 }
 0x5bc   : > { %v1778_v49 = vpop.eup %1777 }
 0x5bd   : > { %v699_v50 = vmul.f32 %v1778_v49, %v1776_v45 }
 0x5bf   : > { %1639 = vmatmul.mubr.msk.f32.vlgmr.msra.gmra.mxu1 %vm452_vm2, %v699_v50 }
 0x5c0   : > { %1647 = vmatpush3.msra.mxu1 %v341_v51  ;;  %1648 = vmatprep.mubr.msk.f32.mxu1 %vm1980_vm0, %v1979_v0 }
 0x5c1   : > { %1656 = vmatprep.subr.mxu1 %v1979_v0 }
 0x5c3   : > { %1649 = vmatmul.mubr.msk.f32.vlgmr.msra.gmra.mxu1 %vm452_vm2, %v607_v35 }
 0x5c4   : > { %1658 = vmatprep.mubr.msk.f32.mxu1 %vm1980_vm0, %v1979_v0 }
 0x67f   : > { %v773_v52 = vpop.f32.mrf.mxu1 }
 0x680   : > { %1644 = vmatmul.mubr.msk.f32.vlgmr.msra.gmra.mxu0 %vm452_vm2, %v773_v52 }
 0x681   : > { %1652 = vmatpush3.xpose.msk.msra.mxu0 %vm452_vm2, %v926_v53  ;;  %v1640_v54 = vpop.f32.mrf.mxu1  ;;  %1653 = vmatprep.mubr.msk.f32.mxu0 %vm1980_vm0, %v1979_v0 }
 0x682   : > { %1661 = vmatprep.subr.mxu0 %v1979_v0 }
 0x683   : > { %v2305_v56 = vpop.f32.mrf.mxu1 }
 0x684   : > { %1654 = vmatmul.mubr.msk.f32.vlgmr.msra.gmra.mxu0 %vm452_vm2, %v924_v55 }
 0x685   : > { %v1650_v57 = vpop.f32.mrf.mxu1  ;;  %1663 = vmatprep.mubr.msk.f32.mxu0 %vm1980_vm0, %v1979_v0 }
 0x740   : > { %v846_v58 = vpop.f32.mrf.mxu0 }
 0x742   : > { %v1645_v59 = vpop.f32.mrf.mxu0 }
 0x744   : > { %v997_v60 = vpop.f32.mrf.mxu0 }
 0x745   : > { %v998_v61 = vadd.f32 %v997_v60, %v2271_v20 }
 0x746   : > { %v1655_v62 = vpop.f32.mrf.mxu0 }
 0x747   : > { %v1001_v63 = vsel %vm452_vm2, %v998_v61, -inf }
 0x748   : > { %1002 = vmax.xlane.f32.xlu0 %v1001_v63 }
 0x75e   : > { %1012 = vrot.lane.b32.xlu0 %v2254_v10, %s1988_s10 }
 0x762   : > { %1162 = vrot.lane.b32.xlu0 %v2259_v16, %s1989_s16 }
 0x7d1   : > { %v1003_v1 = vpop.xlane.xlu0 %1002 }
 0x7d2   : > { %v1004_v2 = vsub.f32 %v998_v61, %v1003_v1 }
 0x7d4   : > { %v1005_v3 = vmul.f32 1.442695, %v1004_v2 }
 0x7d5   : > { %v1013_v4 = vpop.permute.xlu0 %1012 }
 0x7d6   : > { %1779 = vpow2.f32 %v1005_v3  ;;  %1657 = vmatpush3.msra.mxu1 %v1013_v4 }
 0x7d7   : > { %1666 = vmatprep.subr.mxu1 %v1979_v0 }
 0x7d9   : > { %v1163_v12 = vpop.permute.xlu0 %1162 }
 0x7e3   : > { %v1780_v5 = vpop.eup %1779 }
 0x7e4   : > { %v1007_v6 = vsel %vm452_vm2, %v1780_v5, 0.0 }
 0x7e5   : > { %1008 = vadd.xlane.f32.xlu1 %v1007_v6 }
 0x7f6   : > { %1164 = vrot.lane.b32.xlu1 %v2256_v13, %s1990_s9  ;;  %v343_v13 = vld [vmem:[#allocation8 + $0x10] sm:$0xff] }
 0x7f7   : > { %1662 = vmatpush3.msra.mxu0 %v343_v13 }
 0x7f8   : > { %1671 = vmatprep.subr.mxu0 %v1979_v0 }
 0x86e   : > { %v1009_v7 = vpop.xlane.xlu1 %1008 }
 0x86f   : > { %1781 = vrcp.f32 %v1009_v7 }
 0x872   : > { %v1165_v11 = vpop.permute.xlu1 %1164 }
 0x87c   : > { %v1782_v8 = vpop.eup %1781 }
 0x87d   : > { %v1011_v9 = vmul.f32 %v1782_v8, %v1780_v5 }
 0x87f   : > { %1659 = vmatmul.mubr.msk.f32.vlgmr.msra.gmra.mxu1 %vm452_vm2, %v1011_v9 }
 0x880   : > { %1667 = vmatpush3.xpose.msk.msra.mxu1 %vm452_vm2, %v1165_v11  ;;  %1668 = vmatprep.mubr.msk.f32.mxu1 %vm1980_vm0, %v1979_v0 }
 0x881   : > { %1676 = vmatprep.subr.mxu1 %v1979_v0 }
 0x883   : > { %1669 = vmatmul.mubr.msk.f32.vlgmr.msra.gmra.mxu1 %vm452_vm2, %v1163_v12 }
 0x884   : > { %1678 = vmatprep.mubr.msk.f32.mxu1 %vm1980_vm0, %v1979_v0 }
 0x93f   : > { %v1084_v14 = vpop.f32.mrf.mxu1 }
 0x940   : > { %1664 = vmatmul.mubr.msk.f32.vlgmr.msra.gmra.mxu0 %vm452_vm2, %v1084_v14 }
 0x941   : > { %v1660_v15 = vpop.f32.mrf.mxu1  ;;  %1673 = vmatprep.mubr.msk.f32.mxu0 %vm1980_vm0, %v1979_v0  ;;  %v344_v0 = vld [vmem:[#allocation8 + $0x18] sm:$0xff] }
 0x942   : > { %1677 = vmatpush3.msra.mxu1 %v344_v0 }
 0x943   : > { %v1236_v16 = vpop.f32.mrf.mxu1 }
 0x944   : > { %v1237_v17 = vadd.f32 %v1236_v16, %v2271_v20  ;;  %v920_v20 = vadd.f32 %v2305_v56, %v846_v58 }
 0x945   : > { %v1670_v18 = vpop.f32.mrf.mxu1 }
 0x946   : > { %v1240_v19 = vsel %vm452_vm2, %v1237_v17, -inf }
 0x947   : > { %1241 = vmax.xlane.f32.xlu0 %v1240_v19 }
 0x95d   : > { %1251 = vrot.lane.b32.xlu0 %v2254_v10, %s1991_s14 }
 0x9d0   : > { %v1242_v21 = vpop.xlane.xlu0 %1241 }
 0x9d1   : > { %v1243_v22 = vsub.f32 %v1237_v17, %v1242_v21 }
 0x9d3   : > { %v1244_v23 = vmul.f32 1.442695, %v1243_v22 }
 0x9d4   : > { %v1252_v24 = vpop.permute.xlu0 %1251 }
 0x9d5   : > { %1783 = vpow2.f32 %v1244_v23  ;;  %1672 = vmatpush3.msra.mxu0 %v1252_v24 }
 0x9e2   : > { %v1784_v25 = vpop.eup %1783 }
 0x9e3   : > { %v1246_v26 = vsel %vm452_vm2, %v1784_v25, 0.0 }
 0x9e4   : > { %1247 = vadd.xlane.f32.xlu1 %v1246_v26 }
 0xa00   : > { %v1157_v27 = vpop.f32.mrf.mxu0 }
 0xa01   : > { %v1161_v28 = vadd.f32 %v1157_v27, %v920_v20 }
 0xa02   : > { %v1665_v29 = vpop.f32.mrf.mxu0 }
 0xa6d   : > { %v1248_v10 = vpop.xlane.xlu1 %1247 }
 0xa6e   : > { %1785 = vrcp.f32 %v1248_v10 }
 0xa7b   : > { %v1786_v30 = vpop.eup %1785 }
 0xa7c   : > { %v1250_v31 = vmul.f32 %v1786_v30, %v1784_v25 }
 0xa7e   : > { %1674 = vmatmul.mubr.msk.f32.vlgmr.msra.gmra.mxu0 %vm452_vm2, %v1250_v31 }
 0xb3e   : > { %v1323_v32 = vpop.f32.mrf.mxu0 }
 0xb3f   : > { %1679 = vmatmul.mubr.msk.f32.vlgmr.msra.gmra.mxu1 %vm452_vm2, %v1323_v32 }
 0xb40   : > { %v1675_v33 = vpop.f32.mrf.mxu0 }
 0xbff   : > { %v1396_v35 = vpop.f32.mrf.mxu1 }
 0xc00   : > { %v1400_v36 = vadd.f32 %v1396_v35, %v1161_v28 }
 0xc01   : > { %v1680_v37 = vpop.f32.mrf.mxu1 }
 0xc02   : > { %v1407_v38 = vadd.f32 %v1568_v34, %v1400_v36 }
 0xc04   : > { %1408 = vst.msk [vmem:[%s335_s11] sm:$0xff] %vm355_vm1, %v1407_v38 }
 0xc05   : > { %1908 = shalt.err (!%p1905_p4)
}
 0xc06   : > { %s1909_s13 = scalar_lea.hbm %s1421_s17, 128  ;;  %s1913_s10 = scalar_lea.hbm %s2383_s6, 256 }
 0xc07   : > { %p1910_p6 = scmp.ne.s32.totalorder %s1421_s17, %s1909_s13  ;;  %p1914_p11 = scmp.lt.s32.totalorder %s1421_s17, %s2383_s6 }
 0xc08   : > { %p1915_p5 = scmp.lt.s32.totalorder %s1913_s10, %s1909_s13 }
 0xc09   : > { %p1911_p7 = pnand %p1910_p6, %p2412_p10 }
 0xc0a   : > { %p1916_p12 = por %p1915_p5, %p1914_p11 }
 0xc0b   : > { %p1912_p8 = pneg %p1911_p7 }
 0xc0d   : > { %p1917_p0 = pnand %p1916_p12, %p1912_p8 }
 0xc0f   : > { %1920 = shalt.err (!%p1917_p0)
}
 0xc10   : > { %1696 = dma.vmem_to_hbm [thread:$0]  (%p2412_p10), %s1424_s27, 128, %s1421_s17, %s1410_s20  }
 0xc11 PF: > { %s1435_s14 = sand.u32 1, %s1959_s21   ;;  %p2413_p3 = scmp.ne.s32.totalorder %s2394_s28, 0 }
 0xc12   : > { %p2414_p2 = scmp.ge.s32.totalorder %s1971_s24, 2  ;;  %s1436_s15 = scalar_lea.sflag [#allocation4], %s1435_s14 }
 0xc14   : > { %p1713_p9 = pnand %p2414_p2, %p2413_p3 }
 0xc16   : > { %p1714_p13 = pneg %p1713_p9 }
 0xc18   : > { %1954 = dma.done.wait (%p1714_p13), %s1436_s15, 128  }
 0xc19   : > { %1956 = vsyncadd (%p1714_p13), %s1436_s15, 4294967168  ;;  %s2415_s0 = sld [smem:[#allocation16_spill]]  ;;  %p23_p1 = scmp.ge.s32.totalorder %s2106_s19, 4  }
 0xc1a   : > { %s2416_s21 = smov %s1963_s22  ;;  %s2417_s22 = smov %s1967_s23 }
 0xc1b   : > { %s2419_s24 = smov %s2106_s19  ;;  %25 = sbr.rel (!%p23_p1) target bundleno = 12 (0xc), region = 110 }
 0xc1f   : > { %s2418_s23 = smov %s2415_s0 }
 0xc20   :  { %1441 = vsyncpa [#allocation3], 1 }
 0xc21   :  { %1443 = vsyncpa [#allocation3 + $0x1], 1 }
 0xc22   :  { %1444 = vsyncpa [#allocation6], 1 }
 0xc23   :  { %1446 = vsyncpa [#allocation6 + $0x1], 1 }
 0xc24   :  { %1447 = vsyncpa [#allocation9], 1 }
 0xc25   :  { %1448 = vsyncpa [#allocation4], 1 }
 0xc26   :  { %1450 = vsyncpa [#allocation4 + $0x1], 1 }

</bundles_post_ra>
